<compile_context>
chip_gen: v7x
topology: tpu7x:2x2x1
jax: 0.10.0
libtpu: 0.0.40
codegen_flags: <defaults>
</compile_context>

<pallas_src>
import functools

import jax
import jax.numpy as jnp
from jax.experimental import pallas as pl
from jax.experimental.pallas import tpu as pltpu

LN_EPS = 1e-5


def _attention_kernel(x_ref, wqkv_ref, bqkv_ref, wo_ref, bo_ref, out_ref,
                      *, heads, dim_head, eps):
    """One batch element per grid step.

    x_ref    : (1, N, D)        input tokens (f32)
    wqkv_ref : (D, 3*inner)     fused QKV weight, LN-gamma and q-scale folded (bf16)
    bqkv_ref : (1, 3*inner)     fused QKV bias from LN-beta folding (f32)
    wo_ref   : (inner, D)       output projection weight (bf16)
    bo_ref   : (1, D)           output projection bias (f32)
    out_ref  : (1, N, D)        output tokens (f32)
    """
    _, n, d = x_ref.shape
    inner = heads * dim_head

    # ---- LayerNorm statistics (affine already folded into wqkv/bqkv) -------
    x = x_ref[0].astype(jnp.float32)                       # (N, D)
    mean = jnp.mean(x, axis=-1, keepdims=True)
    var = jnp.mean(jnp.square(x - mean), axis=-1, keepdims=True)
    xhat = (x - mean) * jax.lax.rsqrt(var + eps)           # (N, D)

    # ---- fused QKV projection (one wide MXU matmul) -------------------------
    qkv = jnp.dot(xhat.astype(jnp.bfloat16), wqkv_ref[...],
                  preferred_element_type=jnp.float32) + bqkv_ref[...]   # (N, 3*inner) f32

    # ---- per-head softmax attention (static unrolled loop; heads is small) --
    head_outs = []
    for h in range(heads):
        lo = h * dim_head
        q_h = qkv[:, lo:lo + dim_head].astype(jnp.bfloat16)               # (N, dh), scale pre-folded
        k_h = qkv[:, inner + lo:inner + lo + dim_head].astype(jnp.bfloat16)
        v_h = qkv[:, 2 * inner + lo:2 * inner + lo + dim_head].astype(jnp.bfloat16)

        dots = jnp.einsum('qd,kd->qk', q_h, k_h,
                          preferred_element_type=jnp.float32)             # (N, N) f32

        m = jnp.max(dots, axis=-1, keepdims=True)
        p = jnp.exp(dots - m)
        attn = p * pl.reciprocal(jnp.sum(p, axis=-1, keepdims=True), approx=True)

        o_h = jnp.dot(attn.astype(jnp.bfloat16), v_h,
                      preferred_element_type=jnp.float32)                 # (N, dh) f32
        head_outs.append(o_h.astype(jnp.bfloat16))

    # ---- single fused output projection over all heads ---------------------
    o_cat = jnp.concatenate(head_outs, axis=-1)                           # (N, inner) bf16
    out = jnp.dot(o_cat, wo_ref[...],
                  preferred_element_type=jnp.float32) + bo_ref[...]       # (N, D) f32
    out_ref[0] = out.astype(out_ref.dtype)


def attention_pallas(x, gamma, beta, w_qkv, w_out, b_out, *,
                     heads, dim_head, eps=LN_EPS):
    """x: (B, N, D) float32.  Returns (B, N, D) float32.

    w_qkv : (D, 3*inner)   (i.e. torch to_qkv.weight.T)
    w_out : (inner, D)     (i.e. torch to_out[0].weight.T)
    """
    b_sz, n, d = x.shape
    inner = heads * dim_head
    scale = dim_head ** (-0.5)

    # ---- one-time weight folding (wrapper side) ------------------------------
    # LN(x) @ W  =  xhat @ (gamma[:,None] * W)  +  beta @ W
    w = w_qkv * gamma[:, None]                            # (D, 3*inner)
    bias = beta @ w_qkv                                   # (3*inner,)
    # Fold the attention scale into the Q columns.
    col_scale = jnp.concatenate([
        jnp.full((inner,), scale, jnp.float32),
        jnp.ones((2 * inner,), jnp.float32)])
    w = w * col_scale[None, :]
    bias = bias * col_scale

    w_bf = w.astype(jnp.bfloat16)                         # (D, 3*inner) bf16
    wo_bf = w_out.astype(jnp.bfloat16)                    # (inner, D)   bf16
    bias2 = bias.reshape(1, 3 * inner)                    # f32
    bo2 = b_out.reshape(1, d)                             # f32

    kernel = functools.partial(_attention_kernel, heads=heads,
                               dim_head=dim_head, eps=eps)

    return pl.pallas_call(
        kernel,
        out_shape=jax.ShapeDtypeStruct((b_sz, n, d), jnp.float32),
        grid_spec=pltpu.PrefetchScalarGridSpec(
            num_scalar_prefetch=0,
            grid=(b_sz,),
            in_specs=[
                pl.BlockSpec((1, n, d), lambda b: (b, 0, 0)),           # x
                pl.BlockSpec((d, 3 * inner), lambda b: (0, 0)),         # wqkv (constant)
                pl.BlockSpec((1, 3 * inner), lambda b: (0, 0)),         # bqkv (constant)
                pl.BlockSpec((inner, d), lambda b: (0, 0)),             # wo   (constant)
                pl.BlockSpec((1, d), lambda b: (0, 0)),                 # bo   (constant)
            ],
            out_specs=pl.BlockSpec((1, n, d), lambda b: (b, 0, 0)),
        ),
        compiler_params=pltpu.CompilerParams(
            dimension_semantics=("parallel",)),
    )(x, w_bf, bias2, wo_bf, bo2)


def make_params(key, dim, heads, dim_head):
    """Deterministic synthetic parameters (shapes match the PyTorch module)."""
    inner = heads * dim_head
    k1, k2, k3, k4, k5 = jax.random.split(key, 5)
    gamma = 1.0 + 0.1 * jax.random.normal(k1, (dim,), jnp.float32)
    beta = 0.1 * jax.random.normal(k2, (dim,), jnp.float32)
    w_qkv = jax.random.normal(k3, (dim, 3 * inner), jnp.float32) / jnp.sqrt(dim)
    w_out = jax.random.normal(k4, (inner, dim), jnp.float32) / jnp.sqrt(inner)
    b_out = 0.1 * jax.random.normal(k5, (dim,), jnp.float32)
    return gamma, beta, w_qkv, w_out, b_out


def reference_attention(x, gamma, beta, w_qkv, w_out, b_out, *,
                        heads, dim_head, eps=LN_EPS):
    """Pure-JAX f32 reference matching the PyTorch module (dropout p=0)."""
    scale = dim_head ** (-0.5)
    mean = jnp.mean(x, axis=-1, keepdims=True)
    var = jnp.mean(jnp.square(x - mean), axis=-1, keepdims=True)
    xn = (x - mean) / jnp.sqrt(var + eps) * gamma + beta

    qkv = xn @ w_qkv                                        # (B, N, 3*inner)
    q, k, v = jnp.split(qkv, 3, axis=-1)

    def split_heads(t):
        bsz, n, _ = t.shape
        return t.reshape(bsz, n, heads, dim_head).transpose(0, 2, 1, 3)

    q, k, v = split_heads(q), split_heads(k), split_heads(v)
    dots = jnp.einsum('bhqd,bhkd->bhqk', q, k) * scale
    attn = jax.nn.softmax(dots, axis=-1)
    out = jnp.einsum('bhqk,bhkd->bhqd', attn, v)
    out = out.transpose(0, 2, 1, 3).reshape(x.shape[0], x.shape[1],
                                            heads * dim_head)
    return out @ w_out + b_out


if __name__ == "__main__":
    key = jax.random.PRNGKey(0)
    k_x, k_p = jax.random.split(key)

    B, N, DIM = 2, 16, 32
    HEADS, DIM_HEAD = 4, 16          # inner_dim = 64, project_out = True

    x = jax.random.normal(k_x, (B, N, DIM), jnp.float32)
    gamma, beta, w_qkv, w_out, b_out = make_params(k_p, DIM, HEADS, DIM_HEAD)

    out = attention_pallas(x, gamma, beta, w_qkv, w_out, b_out,
                           heads=HEADS, dim_head=DIM_HEAD)
    out = jax.block_until_ready(out)

    ref = reference_attention(x, gamma, beta, w_qkv, w_out, b_out,
                              heads=HEADS, dim_head=DIM_HEAD)

    assert out.shape == (B, N, DIM)
    max_err = float(jnp.max(jnp.abs(out - ref)))
    assert jnp.allclose(out, ref, atol=5e-2, rtol=5e-2), \
        f"mismatch vs reference (max abs err {max_err})"

    print("KERNEL_OK")
</pallas_src>

<mosaic_0001>
module attributes {stable_mosaic.version = 11 : i64} {
  func.func @_attention_kernel(%arg0: i32, %arg1: memref<1x16x32xf32, #tpu.memory_space<vmem>>, %arg2: memref<32x192xbf16, #tpu.memory_space<vmem>>, %arg3: memref<1x192xf32, #tpu.memory_space<vmem>>, %arg4: memref<64x32xbf16, #tpu.memory_space<vmem>>, %arg5: memref<1x32xf32, #tpu.memory_space<vmem>>, %arg6: memref<1x16x32xf32, #tpu.memory_space<vmem>>) attributes {dimension_semantics = [#tpu.dimension_semantics<parallel>], iteration_bounds = array<i64: 2>, scalar_prefetch = 0 : i64, scratch_operands = 0 : i64, tpu.core_type = #tpu.core_type<tc>, window_params = [{transform_indices = @transform_0, window_bounds = array<i64: 1, 16, 32>}, {pipeline_mode = #tpu.pipeline_mode<synchronous>, transform_indices = @transform_1, window_bounds = array<i64: 32, 192>}, {pipeline_mode = #tpu.pipeline_mode<synchronous>, transform_indices = @transform_2, window_bounds = array<i64: 1, 192>}, {pipeline_mode = #tpu.pipeline_mode<synchronous>, transform_indices = @transform_3, window_bounds = array<i64: 64, 32>}, {pipeline_mode = #tpu.pipeline_mode<synchronous>, transform_indices = @transform_4, window_bounds = array<i64: 1, 32>}, {transform_indices = @transform_5, window_bounds = array<i64: 1, 16, 32>}]} {
    %c0 = arith.constant 0 : index
    %c0_0 = arith.constant 0 : index
    %c0_1 = arith.constant 0 : index
    %0 = vector.load %arg1[%c0, %c0_0, %c0_1] : memref<1x16x32xf32, #tpu.memory_space<vmem>>, vector<1x16x32xf32>
    %1 = vector.shape_cast %0 : vector<1x16x32xf32> to vector<16x32xf32>
    %cst = arith.constant dense<0.000000e+00> : vector<16xf32>
    %2 = vector.multi_reduction <add>, %1, %cst [1] : vector<16x32xf32> to vector<16xf32>
    %3 = vector.shape_cast %2 : vector<16xf32> to vector<16x1xf32>
    %cst_2 = arith.constant 3.200000e+01 : f32
    %4 = vector.broadcast %cst_2 : f32 to vector<16x1xf32>
    %5 = arith.divf %3, %4 : vector<16x1xf32>
    %6 = vector.broadcast %5 : vector<16x1xf32> to vector<16x32xf32>
    %7 = arith.subf %1, %6 : vector<16x32xf32>
    %8 = arith.mulf %7, %7 : vector<16x32xf32>
    %cst_3 = arith.constant dense<0.000000e+00> : vector<16xf32>
    %9 = vector.multi_reduction <add>, %8, %cst_3 [1] : vector<16x32xf32> to vector<16xf32>
    %10 = vector.shape_cast %9 : vector<16xf32> to vector<16x1xf32>
    %cst_4 = arith.constant 3.200000e+01 : f32
    %11 = vector.broadcast %cst_4 : f32 to vector<16x1xf32>
    %12 = arith.divf %10, %11 : vector<16x1xf32>
    %13 = vector.broadcast %5 : vector<16x1xf32> to vector<16x32xf32>
    %14 = arith.subf %1, %13 : vector<16x32xf32>
    %cst_5 = arith.constant 9.99999974E-6 : f32
    %15 = vector.broadcast %cst_5 : f32 to vector<16x1xf32>
    %16 = arith.addf %12, %15 : vector<16x1xf32>
    %17 = math.rsqrt %16 : vector<16x1xf32>
    %18 = vector.broadcast %17 : vector<16x1xf32> to vector<16x32xf32>
    %19 = arith.mulf %14, %18 : vector<16x32xf32>
    %20 = arith.truncf %19 : vector<16x32xf32> to vector<16x32xbf16>
    %c0_6 = arith.constant 0 : index
    %c0_7 = arith.constant 0 : index
    %21 = vector.load %arg2[%c0_6, %c0_7] : memref<32x192xbf16, #tpu.memory_space<vmem>>, vector<32x192xbf16>
    %cst_8 = arith.constant dense<0.000000e+00> : vector<16x192xf32>
    %22 = tpu.matmul %20, %21, %cst_8 {dimension_numbers = #tpu.dot_dimension_numbers<[1], [0], [0], [1], [0, 0, 1, 1], [], []>} : vector<16x32xbf16>, vector<32x192xbf16>, vector<16x192xf32> -> vector<16x192xf32>
    %c0_9 = arith.constant 0 : index
    %c0_10 = arith.constant 0 : index
    %23 = vector.load %arg3[%c0_9, %c0_10] : memref<1x192xf32, #tpu.memory_space<vmem>>, vector<1x192xf32>
    %24 = vector.broadcast %23 : vector<1x192xf32> to vector<16x192xf32>
    %25 = arith.addf %22, %24 : vector<16x192xf32>
    %26 = vector.extract_strided_slice %25 {offsets = [0, 0], sizes = [16, 16], strides = [1, 1]} : vector<16x192xf32> to vector<16x16xf32>
    %27 = arith.truncf %26 : vector<16x16xf32> to vector<16x16xbf16>
    %28 = vector.extract_strided_slice %25 {offsets = [0, 64], sizes = [16, 16], strides = [1, 1]} : vector<16x192xf32> to vector<16x16xf32>
    %29 = arith.truncf %28 : vector<16x16xf32> to vector<16x16xbf16>
    %30 = vector.extract_strided_slice %25 {offsets = [0, 128], sizes = [16, 16], strides = [1, 1]} : vector<16x192xf32> to vector<16x16xf32>
    %31 = arith.truncf %30 : vector<16x16xf32> to vector<16x16xbf16>
    "tpu.trace_start"() <{level = 10 : i32, message = "qd,kd->qk"}> : () -> ()
    %cst_11 = arith.constant dense<0.000000e+00> : vector<16x16xf32>
    %32 = tpu.matmul %27, %29, %cst_11 {dimension_numbers = #tpu.dot_dimension_numbers<[1], [1], [0], [0], [0, 0, 1, 0], [], []>} : vector<16x16xbf16>, vector<16x16xbf16>, vector<16x16xf32> -> vector<16x16xf32>
    "tpu.trace_stop"() : () -> ()
    %cst_12 = arith.constant dense<0xFF800000> : vector<16xf32>
    %33 = vector.multi_reduction <maximumf>, %32, %cst_12 [1] : vector<16x16xf32> to vector<16xf32>
    %34 = vector.shape_cast %33 : vector<16xf32> to vector<16x1xf32>
    %35 = vector.broadcast %34 : vector<16x1xf32> to vector<16x16xf32>
    %36 = arith.subf %32, %35 : vector<16x16xf32>
    %37 = math.exp %36 : vector<16x16xf32>
    %cst_13 = arith.constant dense<0.000000e+00> : vector<16xf32>
    %38 = vector.multi_reduction <add>, %37, %cst_13 [1] : vector<16x16xf32> to vector<16xf32>
    %39 = vector.shape_cast %38 : vector<16xf32> to vector<16x1xf32>
    %40 = tpu.reciprocal %39 {approx = true} : vector<16x1xf32> -> vector<16x1xf32>
    %41 = vector.broadcast %40 : vector<16x1xf32> to vector<16x16xf32>
    %42 = arith.mulf %37, %41 : vector<16x16xf32>
    %43 = arith.truncf %42 : vector<16x16xf32> to vector<16x16xbf16>
    %cst_14 = arith.constant dense<0.000000e+00> : vector<16x16xf32>
    %44 = tpu.matmul %43, %31, %cst_14 {dimension_numbers = #tpu.dot_dimension_numbers<[1], [0], [0], [1], [0, 0, 1, 1], [], []>} : vector<16x16xbf16>, vector<16x16xbf16>, vector<16x16xf32> -> vector<16x16xf32>
    %45 = arith.truncf %44 : vector<16x16xf32> to vector<16x16xbf16>
    %46 = vector.extract_strided_slice %25 {offsets = [0, 16], sizes = [16, 16], strides = [1, 1]} : vector<16x192xf32> to vector<16x16xf32>
    %47 = arith.truncf %46 : vector<16x16xf32> to vector<16x16xbf16>
    %48 = vector.extract_strided_slice %25 {offsets = [0, 80], sizes = [16, 16], strides = [1, 1]} : vector<16x192xf32> to vector<16x16xf32>
    %49 = arith.truncf %48 : vector<16x16xf32> to vector<16x16xbf16>
    %50 = vector.extract_strided_slice %25 {offsets = [0, 144], sizes = [16, 16], strides = [1, 1]} : vector<16x192xf32> to vector<16x16xf32>
    %51 = arith.truncf %50 : vector<16x16xf32> to vector<16x16xbf16>
    "tpu.trace_start"() <{level = 10 : i32, message = "qd,kd->qk"}> : () -> ()
    %cst_15 = arith.constant dense<0.000000e+00> : vector<16x16xf32>
    %52 = tpu.matmul %47, %49, %cst_15 {dimension_numbers = #tpu.dot_dimension_numbers<[1], [1], [0], [0], [0, 0, 1, 0], [], []>} : vector<16x16xbf16>, vector<16x16xbf16>, vector<16x16xf32> -> vector<16x16xf32>
    "tpu.trace_stop"() : () -> ()
    %cst_16 = arith.constant dense<0xFF800000> : vector<16xf32>
    %53 = vector.multi_reduction <maximumf>, %52, %cst_16 [1] : vector<16x16xf32> to vector<16xf32>
    %54 = vector.shape_cast %53 : vector<16xf32> to vector<16x1xf32>
    %55 = vector.broadcast %54 : vector<16x1xf32> to vector<16x16xf32>
    %56 = arith.subf %52, %55 : vector<16x16xf32>
    %57 = math.exp %56 : vector<16x16xf32>
    %cst_17 = arith.constant dense<0.000000e+00> : vector<16xf32>
    %58 = vector.multi_reduction <add>, %57, %cst_17 [1] : vector<16x16xf32> to vector<16xf32>
    %59 = vector.shape_cast %58 : vector<16xf32> to vector<16x1xf32>
    %60 = tpu.reciprocal %59 {approx = true} : vector<16x1xf32> -> vector<16x1xf32>
    %61 = vector.broadcast %60 : vector<16x1xf32> to vector<16x16xf32>
    %62 = arith.mulf %57, %61 : vector<16x16xf32>
    %63 = arith.truncf %62 : vector<16x16xf32> to vector<16x16xbf16>
    %cst_18 = arith.constant dense<0.000000e+00> : vector<16x16xf32>
    %64 = tpu.matmul %63, %51, %cst_18 {dimension_numbers = #tpu.dot_dimension_numbers<[1], [0], [0], [1], [0, 0, 1, 1], [], []>} : vector<16x16xbf16>, vector<16x16xbf16>, vector<16x16xf32> -> vector<16x16xf32>
    %65 = arith.truncf %64 : vector<16x16xf32> to vector<16x16xbf16>
    %66 = vector.extract_strided_slice %25 {offsets = [0, 32], sizes = [16, 16], strides = [1, 1]} : vector<16x192xf32> to vector<16x16xf32>
    %67 = arith.truncf %66 : vector<16x16xf32> to vector<16x16xbf16>
    %68 = vector.extract_strided_slice %25 {offsets = [0, 96], sizes = [16, 16], strides = [1, 1]} : vector<16x192xf32> to vector<16x16xf32>
    %69 = arith.truncf %68 : vector<16x16xf32> to vector<16x16xbf16>
    %70 = vector.extract_strided_slice %25 {offsets = [0, 160], sizes = [16, 16], strides = [1, 1]} : vector<16x192xf32> to vector<16x16xf32>
    %71 = arith.truncf %70 : vector<16x16xf32> to vector<16x16xbf16>
    "tpu.trace_start"() <{level = 10 : i32, message = "qd,kd->qk"}> : () -> ()
    %cst_19 = arith.constant dense<0.000000e+00> : vector<16x16xf32>
    %72 = tpu.matmul %67, %69, %cst_19 {dimension_numbers = #tpu.dot_dimension_numbers<[1], [1], [0], [0], [0, 0, 1, 0], [], []>} : vector<16x16xbf16>, vector<16x16xbf16>, vector<16x16xf32> -> vector<16x16xf32>
    "tpu.trace_stop"() : () -> ()
    %cst_20 = arith.constant dense<0xFF800000> : vector<16xf32>
    %73 = vector.multi_reduction <maximumf>, %72, %cst_20 [1] : vector<16x16xf32> to vector<16xf32>
    %74 = vector.shape_cast %73 : vector<16xf32> to vector<16x1xf32>
    %75 = vector.broadcast %74 : vector<16x1xf32> to vector<16x16xf32>
    %76 = arith.subf %72, %75 : vector<16x16xf32>
    %77 = math.exp %76 : vector<16x16xf32>
    %cst_21 = arith.constant dense<0.000000e+00> : vector<16xf32>
    %78 = vector.multi_reduction <add>, %77, %cst_21 [1] : vector<16x16xf32> to vector<16xf32>
    %79 = vector.shape_cast %78 : vector<16xf32> to vector<16x1xf32>
    %80 = tpu.reciprocal %79 {approx = true} : vector<16x1xf32> -> vector<16x1xf32>
    %81 = vector.broadcast %80 : vector<16x1xf32> to vector<16x16xf32>
    %82 = arith.mulf %77, %81 : vector<16x16xf32>
    %83 = arith.truncf %82 : vector<16x16xf32> to vector<16x16xbf16>
    %cst_22 = arith.constant dense<0.000000e+00> : vector<16x16xf32>
    %84 = tpu.matmul %83, %71, %cst_22 {dimension_numbers = #tpu.dot_dimension_numbers<[1], [0], [0], [1], [0, 0, 1, 1], [], []>} : vector<16x16xbf16>, vector<16x16xbf16>, vector<16x16xf32> -> vector<16x16xf32>
    %85 = arith.truncf %84 : vector<16x16xf32> to vector<16x16xbf16>
    %86 = vector.extract_strided_slice %25 {offsets = [0, 48], sizes = [16, 16], strides = [1, 1]} : vector<16x192xf32> to vector<16x16xf32>
    %87 = arith.truncf %86 : vector<16x16xf32> to vector<16x16xbf16>
    %88 = vector.extract_strided_slice %25 {offsets = [0, 112], sizes = [16, 16], strides = [1, 1]} : vector<16x192xf32> to vector<16x16xf32>
    %89 = arith.truncf %88 : vector<16x16xf32> to vector<16x16xbf16>
    %90 = vector.extract_strided_slice %25 {offsets = [0, 176], sizes = [16, 16], strides = [1, 1]} : vector<16x192xf32> to vector<16x16xf32>
    %91 = arith.truncf %90 : vector<16x16xf32> to vector<16x16xbf16>
    "tpu.trace_start"() <{level = 10 : i32, message = "qd,kd->qk"}> : () -> ()
    %cst_23 = arith.constant dense<0.000000e+00> : vector<16x16xf32>
    %92 = tpu.matmul %87, %89, %cst_23 {dimension_numbers = #tpu.dot_dimension_numbers<[1], [1], [0], [0], [0, 0, 1, 0], [], []>} : vector<16x16xbf16>, vector<16x16xbf16>, vector<16x16xf32> -> vector<16x16xf32>
    "tpu.trace_stop"() : () -> ()
    %cst_24 = arith.constant dense<0xFF800000> : vector<16xf32>
    %93 = vector.multi_reduction <maximumf>, %92, %cst_24 [1] : vector<16x16xf32> to vector<16xf32>
    %94 = vector.shape_cast %93 : vector<16xf32> to vector<16x1xf32>
    %95 = vector.broadcast %94 : vector<16x1xf32> to vector<16x16xf32>
    %96 = arith.subf %92, %95 : vector<16x16xf32>
    %97 = math.exp %96 : vector<16x16xf32>
    %cst_25 = arith.constant dense<0.000000e+00> : vector<16xf32>
    %98 = vector.multi_reduction <add>, %97, %cst_25 [1] : vector<16x16xf32> to vector<16xf32>
    %99 = vector.shape_cast %98 : vector<16xf32> to vector<16x1xf32>
    %100 = tpu.reciprocal %99 {approx = true} : vector<16x1xf32> -> vector<16x1xf32>
    %101 = vector.broadcast %100 : vector<16x1xf32> to vector<16x16xf32>
    %102 = arith.mulf %97, %101 : vector<16x16xf32>
    %103 = arith.truncf %102 : vector<16x16xf32> to vector<16x16xbf16>
    %cst_26 = arith.constant dense<0.000000e+00> : vector<16x16xf32>
    %104 = tpu.matmul %103, %91, %cst_26 {dimension_numbers = #tpu.dot_dimension_numbers<[1], [0], [0], [1], [0, 0, 1, 1], [], []>} : vector<16x16xbf16>, vector<16x16xbf16>, vector<16x16xf32> -> vector<16x16xf32>
    %105 = arith.truncf %104 : vector<16x16xf32> to vector<16x16xbf16>
    %106 = tpu.concatenate %45, %65, %85, %105 in 1 : vector<16x16xbf16>, vector<16x16xbf16>, vector<16x16xbf16>, vector<16x16xbf16> -> vector<16x64xbf16>
    %c0_27 = arith.constant 0 : index
    %c0_28 = arith.constant 0 : index
    %107 = vector.load %arg4[%c0_27, %c0_28] : memref<64x32xbf16, #tpu.memory_space<vmem>>, vector<64x32xbf16>
    %cst_29 = arith.constant dense<0.000000e+00> : vector<16x32xf32>
    %108 = tpu.matmul %106, %107, %cst_29 {dimension_numbers = #tpu.dot_dimension_numbers<[1], [0], [0], [1], [0, 0, 1, 1], [], []>} : vector<16x64xbf16>, vector<64x32xbf16>, vector<16x32xf32> -> vector<16x32xf32>
    %c0_30 = arith.constant 0 : index
    %c0_31 = arith.constant 0 : index
    %109 = vector.load %arg5[%c0_30, %c0_31] : memref<1x32xf32, #tpu.memory_space<vmem>>, vector<1x32xf32>
    %110 = vector.broadcast %109 : vector<1x32xf32> to vector<16x32xf32>
    %111 = arith.addf %108, %110 : vector<16x32xf32>
    %c0_32 = arith.constant 0 : index
    %c0_33 = arith.constant 0 : index
    %c0_34 = arith.constant 0 : index
    %112 = vector.load %arg6[%c0_32, %c0_33, %c0_34] : memref<1x16x32xf32, #tpu.memory_space<vmem>>, vector<1x16x32xf32>
    %113 = vector.shape_cast %112 : vector<1x16x32xf32> to vector<16x32xf32>
    %114 = vector.shape_cast %111 : vector<16x32xf32> to vector<1x16x32xf32>
    tpu.vector_store %arg6[%c0_32, %c0_33, %c0_34], %114 {strides = array<i32>} : memref<1x16x32xf32, #tpu.memory_space<vmem>>, vector<1x16x32xf32>,
    return
  }
  func.func @transform_0(%arg0: i32) -> (i32, i32, i32) {
    %c0_i32 = arith.constant 0 : i32
    %c0_i32_0 = arith.constant 0 : i32
    %c0_i32_1 = arith.constant 0 : i32
    return %arg0, %c0_i32, %c0_i32_0 : i32, i32, i32
  }
  func.func @transform_1(%arg0: i32) -> (i32, i32) {
    %c0_i32 = arith.constant 0 : i32
    %c0_i32_0 = arith.constant 0 : i32
    %c0_i32_1 = arith.constant 0 : i32
    return %c0_i32, %c0_i32_0 : i32, i32
  }
  func.func @transform_2(%arg0: i32) -> (i32, i32) {
    %c0_i32 = arith.constant 0 : i32
    %c0_i32_0 = arith.constant 0 : i32
    %c0_i32_1 = arith.constant 0 : i32
    return %c0_i32, %c0_i32_0 : i32, i32
  }
  func.func @transform_3(%arg0: i32) -> (i32, i32) {
    %c0_i32 = arith.constant 0 : i32
    %c0_i32_0 = arith.constant 0 : i32
    %c0_i32_1 = arith.constant 0 : i32
    return %c0_i32, %c0_i32_0 : i32, i32
  }
  func.func @transform_4(%arg0: i32) -> (i32, i32) {
    %c0_i32 = arith.constant 0 : i32
    %c0_i32_0 = arith.constant 0 : i32
    %c0_i32_1 = arith.constant 0 : i32
    return %c0_i32, %c0_i32_0 : i32, i32
  }
  func.func @transform_5(%arg0: i32) -> (i32, i32, i32) {
    %c0_i32 = arith.constant 0 : i32
    %c0_i32_0 = arith.constant 0 : i32
    %c0_i32_1 = arith.constant 0 : i32
    return %arg0, %c0_i32, %c0_i32_0 : i32, i32, i32
  }
}

</mosaic_0001>

<bundles_post_ra>
// kernel: tpu_custom_call.1
= control target key start
LH: loop header
LB: loop body
LE: loop exit
PB: predicated region body
PF: predicated region fallthrough
CT: control target
= control target key end

     0   :  { %10 = vsyncpa [#allocation3], 0  ;;  %s1651_s0 = inlined_call_operand.vmem [shape: f32[2,16,32], index: 0, kind: input, shape index: {}]   ;;  %s1652_s1 = inlined_call_operand.hbm [shape: bf16[32,192], index: 1, kind: input, shape index: {}]   ;;  %s1653_s2 = inlined_call_operand.vmem [shape: f32[1,192], index: 2, kind: input, shape index: {}]   ;;  %s1654_s3 = inlined_call_operand.vmem [shape: bf16[64,32], index: 3, kind: input, shape index: {}]   ;;  %s1655_s4 = inlined_call_operand.vmem [shape: f32[1,32], index: 4, kind: input, shape index: {}]   ;;  %s1656_s5 = inlined_call_operand.hbm [shape: f32[2,16,32], index: 5, kind: output, shape index: {}]  }
   0x1   :  { %11 = vsyncpa [#allocation4], 0 }
   0x2   :  { %13 = vsyncpa [#allocation4 + $0x1], 0  ;;  %s1398_s18 = smov 0   ;;  %s1400_s19 = smov 0  }
   0x3   :  { %s1402_s20 = smov 0   ;;  %s1404_s21 = smov 0  }
   0x4 LB: > { %s1419_s22 = sadd.s32 4294967295, %s1350_s21   ;;  %s1030_s23 = sadd.s32 4294967294, %s1350_s21   ;;  %s1350_s21 = sphi %s1404_s21, %s1672_s21   ;;  %s1346_s20 = sphi %s1402_s20, %s1671_s20   ;;  %s1342_s19 = sphi %s1400_s19, %s1670_s19   ;;  %s1338_s18 = sphi %s1398_s18, %s1669_s18  }
   0x5   : > { %s1423_s24 = sadd.s32 1, %s1350_s21   ;;  %s136_s25 = sadd.s32 1, %s1346_s20 }
   0x6   : > { %s133_s26 = ssub.s32 %s1350_s21, %s1423_s24  ;;  %p146_p0 = scmp.ne.s32.totalorder %s1346_s20, %s1342_s19 }
   0x7   : > { %p134_p1 = scmp.eq.s32.totalorder %s133_s26, 0  ;;  %p147_p2 = scmp.eq.s32.totalorder %s1419_s22, 1 }
   0x8   : > { %p152_p3 = scmp.ne.s32.totalorder %s1342_s19, %s1338_s18  ;;  %p153_p4 = scmp.eq.s32.totalorder %s1030_s23, 1 }
   0x9   : > { %s1434_s27 = scalar_select %p134_p1, %s1346_s20, %s136_s25  }
   0xa   : > { %p1436_p5 = por %p147_p2, %p146_p0  ;;  %p1440_p6 = por %p153_p4, %p152_p3 }
   0xb   : > { %p1031_p7 = scmp.ge.s32.totalorder %s1350_s21, 1  ;;  %p160_p8 = scmp.lt.s32.totalorder %s1350_s21, 3 }
   0xc   : > { %s1660_s28 = scalar_select %p1436_p5, 1, 0 }
   0xd   : > { %s1661_s29 = scalar_select %p1440_p6, 1, 0 }
   0xe   : > { %p1657_p9 = scmp.eq.s32.totalorder %s1419_s22, 0  ;;  %p1447_p10 = pnand %p1031_p7, %p160_p8 }
   0xf   : > { %s1352_s6 = smov [#allocation2]   ;;  %s1256_s11 = scalar_lea.hbm %s1652_s1, 512 }
  0x10   : > { %s1662_s30 = scalar_select %p1447_p10, 1, 0 }
  0x11   : > { %s172_s7 = sshll.u32 %s1352_s6, 4  ;;  %p1152_p11 = pneg %p1447_p10  ;;  %s173_s7 = int_to_ptr.vmem [resolvable:$true] %s172_s7 }
  0x12   : > { %p1257_p13 = scmp.ne.s32.totalorder %s1652_s1, %s1256_s11  ;;  %p1263_p3 = scmp.lt.u32.totalorder %s1256_s11, %s1652_s1 }
  0x13   : > { %p1455_p12 = pnand %p1657_p9, %p1152_p11 }
  0x15   : > { %p1258_p0 = pneg %p1455_p12 }
  0x17   : > { %p1259_p1 = pnand %p1258_p0, %p1257_p13 }
  0x19   : > { %p1260_p2 = pneg %p1259_p1 }
  0x1b   : > { %p1265_p4 = pnand %p1263_p3, %p1260_p2 }
  0x1d   : > { %1268 = shalt.err (!%p1265_p4)
}
  0x1e   : > { %s1269_s16 = scalar_lea.vmem %s173_s7, 512  ;;  %p1277_p9 = scmp.lt.s32.totalorder %s173_s7, %s173_s7 }
  0x1f   : > { %p1270_p7 = scmp.ne.s32.totalorder %s173_s7, %s1269_s16  ;;  %p1278_p6 = scmp.lt.s32.totalorder %s1269_s16, %s1269_s16 }
  0x21   : > { %p1272_p8 = pnand %p1270_p7, %p1258_p0  ;;  %p1279_p5 = por %p1278_p6, %p1277_p9 }
  0x23   : > { %p1273_p11 = pneg %p1272_p8 }
  0x25   : > { %p1280_p10 = pnand %p1279_p5, %p1273_p11 }
  0x27   : > { %1283 = shalt.err (!%p1280_p10)
}
  0x28   : > { %s1353_s17 = smov 128   ;;  %s1354_s23 = smov 8  }
  0x29   : > { %1155 = dma.hbm_to_vmem [thread:$0]  (!%p1455_p12), %s1652_s1, 512, %s173_s7, [#allocation3], %s1353_s17, %s1353_s17, %s1354_s23  }
  0x2a   : > { %p1664_p13 = scmp.ne.s32.totalorder %s1662_s30, 0 }
  0x2b   : > { %p1665_p1 = scmp.eq.s32.totalorder (!%p1664_p13), %s1419_s22, 0 }
  0x2c   : > { %205 = sbr.rel (%p1664_p13) target bundleno = 1875 (0x753), region = 40 }
  0x33   : > { %1329 = dma.done.wait (%p1665_p1), [#allocation3], 512   ;;  %p1666_p0 = pmov %p1665_p1 }
  0x34   : > { %p233_p5 = scmp.lt.s32.totalorder %s1419_s22, 1  ;;  %vm241_vm0 = vcmask 261120   ;;  %v1210_v14 = vld [vmem:[#allocation2 + $0x4] ss:$8 sps:$4 sm:$0xff]   ;;  %v1212_v15 = vld [vmem:[#allocation2] ss:$8 sps:$4 sm:$0xff]   ;;  %v276_v31 = vlaneseq }
  0x35   : > { %1331 = vsyncadd (%p1666_p0), [#allocation3], 4294966784  ;;  %v1213_v16 = vld [vmem:[#allocation2 + $0x14] ss:$8 sps:$4 sm:$0xff]   ;;  %309 = vmatprep.subr.bf16.mxu0 %v1210_v14  ;;  %v1355_v17 = vmov 0   ;;  %v1356_v30 = vmov 0.0  }
  0x36   : > { %s234_s6 = scalar_select %p233_p5, %s1419_s22, 1  ;;  %341 = vmatprep.mubr.bf16.mxu0 %v1355_v17  ;;  %310 = vmatpush1.bf16.msra.mxu0 %v1212_v15  ;;  %v1215_v18 = vld [vmem:[#allocation2 + $0x10] ss:$8 sps:$4 sm:$0xff]   ;;  %v277_v32 = vshrl.u32 %v276_v31, 7  ;;  %v274_v34 = vld [vmem:[%s1653_s2] sm:$0x3] }
  0x37   : > { %311 = vmatprep.subr.bf16.mxu0 %v1213_v16  ;;  %1086 = vmatprep.subr.bf16.mxu1 %v1356_v30  ;;  %vm1357_vm1 = vmmov 0   ;;  %s1358_s12 = smov 48   ;;  %s1359_s13 = smov 64   ;;  %vm357_vm2 = vcmask 130048   ;;  %vm854_vm3 = vcmask 392192   ;;  %vm896_vm4 = vcmask 523264  }
  0x38   : > { %s1063_s9 = sshll.u32 %s234_s6, 4  ;;  %v278_v33 = vsub.s32 0, %v277_v32  ;;  %v282_v35 = vsub.s32 1, %v277_v32  ;;  %1088 = vmatprep.mubr.msk.bf16.mxu1 %vm1357_vm1, %v1356_v30  ;;  %s1360_s14 = smov 112  }
  0x39   : > { %s237_s11 = scalar_lea.vmem %s1651_s0, %s1063_s9  ;;  %s1361_s15 = smov 96  }
  0x3a   : > { %v239_v0 = vld [vmem:[%s237_s11] sm:$0xff]  ;;  %v240_v1 = vld [vmem:[%s237_s11 + $0x8] sm:$0xff]  ;;  %312 = vmatpush1.bf16.msra.mxu0 %v1215_v18  ;;  %v279_v36 = vrot.slane %v274_v34, %v278_v33  ;;  %v283_v38 = vrot.slane %v274_v34, %v282_v35  ;;  %s1362_s16 = smov 32   ;;  %s1363_s17 = smov 80  }
  0x3b   : > { %v242_v2 = vsel %vm241_vm0, %v239_v0, 0.0  ;;  %v245_v3 = vsel %vm241_vm0, %v240_v1, 0.0  ;;  %1092 = vmatprep.subr.bf16.mxu0 %v1356_v30  ;;  %s1364_s23 = smov 16   ;;  %s230_s7 = sand.u32 1, %s1342_s19  }
  0x3c   : > { %243 = vadd.xlane.f32.xlu0 %v242_v2  ;;  %p1667_p9 = scmp.ne.s32.totalorder %s1660_s28, 0  ;;  %s1365_s9 = smov [#allocation5]  }
  0x3d   : > { %s1288_s10 = sshll.u32 %s1365_s9, 4  ;;  %s1289_s10 = int_to_ptr.vmem [resolvable:$false] %s1288_s10 }
  0x3e   : > { %s1290_s8 = scalar_lea.vmem %s1289_s10, 512 }
  0x40   : > { %246 = vadd.xlane.f32.xlu0 %v245_v3 }
  0xc9   : > { %v244_v4 = vpop.xlane.xlu0 %243 }
  0xca   : > { %v249_v5 = vmul.f32 0.03125, %v244_v4 }
  0xcc   : > { %v251_v6 = vsub.f32 %v239_v0, %v249_v5 }
  0xcd   : > { %v247_v7 = vpop.xlane.xlu0 %246 }
  0xce   : > { %v250_v8 = vmul.f32 0.03125, %v247_v7  ;;  %v253_v9 = vmul.f32 %v251_v6, %v251_v6 }
  0xd0   : > { %v252_v10 = vsub.f32 %v240_v1, %v250_v8  ;;  %v255_v11 = vsel %vm241_vm0, %v253_v9, 0.0 }
  0xd1   : > { %256 = vadd.xlane.f32.xlu1 %v255_v11 }
  0xd2   : > { %v254_v12 = vmul.f32 %v252_v10, %v252_v10 }
  0xd4   : > { %v258_v13 = vsel %vm241_vm0, %v254_v12, 0.0 }
  0xd5   : > { %259 = vadd.xlane.f32.xlu1 %v258_v13 }
 0x15e   : > { %v257_v19 = vpop.xlane.xlu1 %256 }
 0x15f   : > { %v261_v20 = vmul.f32 0.03125, %v257_v19 }
 0x161   : > { %v263_v21 = vadd.f32 1e-05, %v261_v20 }
 0x162   : > { %v260_v22 = vpop.xlane.xlu1 %259 }
 0x163   : > { %v262_v23 = vmul.f32 0.03125, %v260_v22  ;;  %1220 = vrsqrt.f32 %v263_v21 }
 0x165   : > { %v264_v24 = vadd.f32 1e-05, %v262_v23 }
 0x167   : > { %1222 = vrsqrt.f32 %v264_v24 }
 0x16d   : > { %v1221_v25 = vpop.eup %1220 }
 0x16e   : > { %v267_v27 = vmul.f32 %v1221_v25, %v251_v6 }
 0x171   : > { %v1223_v26 = vpop.eup %1222 }
 0x172   : > { %v268_v28 = vmul.f32 %v1223_v26, %v252_v10 }
 0x174   : > { %v269_v29 = vpack.c.bf16 %v268_v28, %v267_v27 }
 0x176   : > { %1043 = vmatmul.mubr.msk.bf16.vlgmr.msra.gmra.mrb[0].mxu0 %vm241_vm0, %v269_v29 }
 0x177   : > { %1094 = vmatprep.mubr.msk.bf16.mxu0 %vm1357_vm1, %v1356_v30 }
 0x249   : > { %v343_v37 = vpop.f32.mrb[0].mxu0 }
 0x24a   : > { %v345_v39 = vpop.f32.mrb[1].mxu0  ;;  %v344_v41 = vadd.f32 %v343_v37, %v279_v36 }
 0x24b   : > { %v347_v40 = vpop.f32.mrb[2].mxu0  ;;  %v346_v44 = vadd.f32 %v345_v39, %v283_v38 }
 0x24c   : > { %v348_v42 = vadd.f32 %v347_v40, %v279_v36  ;;  %v349_v43 = vpop.f32.mrb[3].mxu0 }
 0x24d   : > { %v350_v45 = vadd.f32 %v349_v43, %v283_v38 }
 0x24e   : > { %v352_v46 = vpack.c.bf16 %v348_v42, %v344_v41 }
 0x24f   : > { %v1500_v47 = vpack.c.bf16 %v350_v45, %v346_v44 }
 0x250   : > { %475 = vrot.lane.b32.xlu1 %v352_v46, %s1358_s12  ;;  %355 = vrot.lane.b32.xlu0 %v352_v46, %s1359_s13  ;;  %s1036_s13 = sshll.u32 %s230_s7, 4 }
 0x251   : > { %1093 = vmatpush3.bf16.msra.mxu0 %v1500_v47 }
 0x252   : > { %1104 = vmatprep.subr.bf16.mxu0 %v1356_v30 }
 0x254   : > { %473 = vrot.lane.b32.xlu1 %v352_v46, %s1360_s14  ;;  %596 = vrot.lane.b32.xlu0 %v352_v46, %s1361_s15 }
 0x258   : > { %598 = vrot.lane.b32.xlu1 %v352_v46, %s1362_s16  ;;  %718 = vrot.lane.b32.xlu0 %v352_v46, %s1363_s17 }
 0x25c   : > { %720 = vrot.lane.b32.xlu1 %v352_v46, %s1364_s23 }
 0x2c2   : > { %v356_v48 = vpop.permute.xlu0 %355  ;;  %v476_v50 = vpop.permute.xlu1 %475 }
 0x2c3   : > { %v362_v49 = vsel %vm357_vm2, %v356_v48, 0  ;;  %v481_v52 = vsel %vm357_vm2, %v476_v50, 0 }
 0x2c4   : > { %1087 = vmatpush3.bf16.xpose.msra.mxu1 %v362_v49 }
 0x2c5   : > { %1098 = vmatprep.subr.bf16.mxu1 %v1356_v30 }
 0x2c6   : > { %v474_v51 = vpop.permute.xlu1 %473  ;;  %v597_v56 = vpop.permute.xlu0 %596 }
 0x2ca   : > { %v599_v53 = vpop.permute.xlu1 %598  ;;  %v719_v58 = vpop.permute.xlu0 %718 }
 0x2cb   : > { %1089 = vmatmul.mubr.msk.bf16.vlgmr.msra.gmra.mrb[0].mxu1 %vm357_vm2, %v352_v46  ;;  %v604_v54 = vsel %vm357_vm2, %v599_v53, 0 }
 0x2cc   : > { %1099 = vmatpush3.bf16.xpose.msra.mxu1 %v481_v52  ;;  %1100 = vmatprep.mubr.msk.bf16.mxu1 %vm1357_vm1, %v1356_v30 }
 0x2cd   : > { %1110 = vmatprep.subr.bf16.mxu1 %v1356_v30 }
 0x2ce   : > { %v721_v55 = vpop.permute.xlu1 %720 }
 0x2cf   : > { %v726_v57 = vsel %vm357_vm2, %v721_v55, 0 }
 0x2d3   : > { %1101 = vmatmul.mubr.msk.bf16.vlgmr.msra.gmra.mrb[4].mxu1 %vm357_vm2, %v474_v51 }
 0x2d4   : > { %1111 = vmatpush3.bf16.xpose.msra.mxu1 %v604_v54  ;;  %1112 = vmatprep.mubr.msk.bf16.mxu1 %vm1357_vm1, %v1356_v30 }
 0x2d5   : > { %1122 = vmatprep.subr.bf16.mxu1 %v1356_v30 }
 0x2db   : > { %1113 = vmatmul.mubr.msk.bf16.vlgmr.msra.gmra.mrb[8].mxu1 %vm357_vm2, %v597_v56 }
 0x2dc   : > { %1123 = vmatpush3.bf16.xpose.msra.mxu1 %v726_v57  ;;  %1124 = vmatprep.mubr.msk.bf16.mxu1 %vm1357_vm1, %v1356_v30 }
 0x2dd   : > { %1134 = vmatprep.subr.bf16.mxu1 %v1356_v30 }
 0x2e3   : > { %1125 = vmatmul.mubr.msk.bf16.vlgmr.msra.gmra.mrb[12].mxu1 %vm357_vm2, %v719_v58 }
 0x2e4   : > { %1142 = vmatprep.mubr.msk.bf16.mxu1 %vm1357_vm1, %v1356_v30 }
 0x39e   : > { %v398_v59 = vpop.f32.mrb[0].mxu1 }
 0x39f   : > { %v1090_v60 = vpop.f32.mrb[1].mxu1  ;;  %v405_v61 = vsel %vm357_vm2, %v398_v59, -inf }
 0x3a0   : > { %406 = vmax.xlane.f32.xlu1 %v405_v61  ;;  %v401_v62 = vpop.f32.mrb[2].mxu1 }
 0x3a1   : > { %v1091_v63 = vpop.f32.mrb[3].mxu1  ;;  %v408_v0 = vsel %vm357_vm2, %v401_v62, -inf }
 0x3a2   : > { %409 = vmax.xlane.f32.xlu0 %v408_v0 }
 0x3a6   : > { %v1532_v1 = vpop.f32.mrb[4].mxu1 }
 0x3a7   : > { %v1102_v2 = vpop.f32.mrb[5].mxu1  ;;  %v524_v3 = vsel %vm357_vm2, %v1532_v1, -inf }
 0x3a8   : > { %525 = vmax.xlane.f32.xlu0 %v524_v3  ;;  %v520_v4 = vpop.f32.mrb[6].mxu1 }
 0x3a9   : > { %v1103_v5 = vpop.f32.mrb[7].mxu1  ;;  %v527_v6 = vsel %vm357_vm2, %v520_v4, -inf }
 0x3ac   : > { %528 = vmax.xlane.f32.xlu0 %v527_v6 }
 0x3ae   : > { %v640_v7 = vpop.f32.mrb[8].mxu1 }
 0x3af   : > { %v1114_v8 = vpop.f32.mrb[9].mxu1  ;;  %v647_v9 = vsel %vm357_vm2, %v640_v7, -inf }
 0x3b0   : > { %648 = vmax.xlane.f32.xlu1 %v647_v9  ;;  %v643_v10 = vpop.f32.mrb[10].mxu1 }
 0x3b1   : > { %v1115_v11 = vpop.f32.mrb[11].mxu1  ;;  %v650_v12 = vsel %vm357_vm2, %v643_v10, -inf }
 0x3b2   : > { %651 = vmax.xlane.f32.xlu0 %v650_v12 }
 0x3b6   : > { %v762_v13 = vpop.f32.mrb[12].mxu1 }
 0x3b7   : > { %v1126_v14 = vpop.f32.mrb[13].mxu1  ;;  %v769_v15 = vsel %vm357_vm2, %v762_v13, -inf }
 0x3b8   : > { %770 = vmax.xlane.f32.xlu1 %v769_v15  ;;  %v765_v16 = vpop.f32.mrb[14].mxu1 }
 0x3b9   : > { %v1127_v17 = vpop.f32.mrb[15].mxu1  ;;  %v772_v18 = vsel %vm357_vm2, %v765_v16, -inf }
 0x3ba   : > { %773 = vmax.xlane.f32.xlu0 %v772_v18 }
 0x42d   : > { %v407_v19 = vpop.xlane.xlu1 %406 }
 0x42e   : > { %v411_v20 = vsub.f32 %v398_v59, %v407_v19 }
 0x42f   : > { %v410_v21 = vpop.xlane.xlu0 %409 }
 0x430   : > { %v413_v22 = vmul.f32 1.442695, %v411_v20  ;;  %v412_v23 = vsub.f32 %v401_v62, %v410_v21 }
 0x432   : > { %1224 = vpow2.f32 %v413_v22  ;;  %v415_v24 = vmul.f32 1.442695, %v412_v23 }
 0x434   : > { %1226 = vpow2.f32 %v415_v24 }
 0x435   : > { %v526_v25 = vpop.xlane.xlu0 %525 }
 0x436   : > { %v530_v46 = vsub.f32 %v1532_v1, %v526_v25 }
 0x438   : > { %v532_v49 = vmul.f32 1.442695, %v530_v46 }
 0x439   : > { %v529_v26 = vpop.xlane.xlu0 %528 }
 0x43a   : > { %v531_v27 = vsub.f32 %v520_v4, %v529_v26 }
 0x43c   : > { %v1225_v28 = vpop.eup %1224  ;;  %v534_v29 = vmul.f32 1.442695, %v531_v27 }
 0x43d   : > { %v417_v31 = vsel %vm357_vm2, %v1225_v28, 0.0  ;;  %v649_v48 = vpop.xlane.xlu1 %648 }
 0x43e   : > { %v1227_v32 = vpop.eup %1226  ;;  %1228 = vpow2.f32 %v534_v29  ;;  %418 = vadd.xlane.f32.xlu1 %v417_v31  ;;  %v653_v50 = vsub.f32 %v640_v7, %v649_v48 }
 0x43f   : > { %v652_v33 = vpop.xlane.xlu0 %651  ;;  %v420_v34 = vsel %vm357_vm2, %v1227_v32, 0.0 }
 0x440   : > { %v654_v35 = vsub.f32 %v643_v10, %v652_v33  ;;  %421 = vadd.xlane.f32.xlu0 %v420_v34  ;;  %v655_v52 = vmul.f32 1.442695, %v653_v50  ;;  %v1216_v33 = vld [vmem:[%s1654_s3] sm:$0xff]   ;;  %v1217_v34 = vld [vmem:[%s1654_s3 + $0x8] sm:$0xff]  }
 0x441   : > { %1135 = vmatpush3.bf16.msra.mxu1 %v1216_v33 }
 0x442   : > { %v657_v36 = vmul.f32 1.442695, %v654_v35  ;;  %1136 = vmatprep.subr.bf16.mxu1 %v1356_v30 }
 0x444   : > { %1230 = vpow2.f32 %v657_v36  ;;  %v1218_v36 = vld [vmem:[%s1654_s3 + $0x10] sm:$0xff]  }
 0x445   : > { %v771_v51 = vpop.xlane.xlu1 %770  ;;  %1137 = vmatpush3.bf16.msra.mxu1 %v1217_v34 }
 0x446   : > { %v775_v53 = vsub.f32 %v762_v13, %v771_v51  ;;  %1138 = vmatprep.subr.bf16.mxu1 %v1356_v30 }
 0x447   : > { %v774_v37 = vpop.xlane.xlu0 %773 }
 0x448   : > { %v1229_v38 = vpop.eup %1228  ;;  %v776_v39 = vsub.f32 %v765_v16, %v774_v37  ;;  %v777_v54 = vmul.f32 1.442695, %v775_v53 }
 0x449   : > { %v539_v40 = vsel %vm357_vm2, %v1229_v38, 0.0  ;;  %1139 = vmatpush3.bf16.msra.mxu1 %v1218_v36 }
 0x44a   : > { %v779_v41 = vmul.f32 1.442695, %v776_v39  ;;  %540 = vadd.xlane.f32.xlu0 %v539_v40  ;;  %v1219_v39 = vld [vmem:[%s1654_s3 + $0x18] sm:$0xff]   ;;  %1140 = vmatprep.subr.bf16.mxu1 %v1356_v30 }
 0x44c   : > { %1232 = vpow2.f32 %v779_v41 }
 0x44d   : > { %1234 = vpow2.f32 %v532_v49  ;;  %1141 = vmatpush3.bf16.msra.mxu1 %v1219_v39 }
 0x44e   : > { %v1544_v42 = vpop.eup %1230  ;;  %1236 = vpow2.f32 %v655_v52 }
 0x44f   : > { %548 = vrot.lane.b32.xlu1 %v1500_v47, %s1360_s14  ;;  %v662_v43 = vsel %vm357_vm2, %v1544_v42, 0.0  ;;  %1238 = vpow2.f32 %v777_v54 }
 0x450   : > { %663 = vadd.xlane.f32.xlu0 %v662_v43 }
 0x456   : > { %v1550_v44 = vpop.eup %1232 }
 0x457   : > { %v784_v45 = vsel %vm357_vm2, %v1550_v44, 0.0  ;;  %v1235_v55 = vpop.eup %1234 }
 0x458   : > { %785 = vadd.xlane.f32.xlu0 %v784_v45  ;;  %v536_v56 = vsel %vm357_vm2, %v1235_v55, 0.0  ;;  %v1237_v57 = vpop.eup %1236 }
 0x459   : > { %v659_v58 = vsel %vm357_vm2, %v1237_v57, 0.0  ;;  %v1239_v59 = vpop.eup %1238 }
 0x45a   : > { %v781_v60 = vsel %vm357_vm2, %v1239_v59, 0.0 }
 0x46e   : > { %670 = vrot.lane.b32.xlu0 %v1500_v47, %s1361_s15 }
 0x473   : > { %537 = vadd.xlane.f32.xlu1 %v536_v56 }
 0x477   : > { %660 = vadd.xlane.f32.xlu1 %v659_v58  ;;  %v1052_v58 = vld [vmem:[%s1655_s4] ss:$0 sm:$0xff] }
 0x47b   : > { %782 = vadd.xlane.f32.xlu1 %v781_v60 }
 0x48c   : > { %792 = vrot.lane.b32.xlu1 %v1500_v47, %s1363_s17  ;;  %s1064_s17 = sshll.u32 %s1419_s22, 8  ;;  %s1610_s22 = scalar_lea.sflag [#allocation4], %s230_s7 }
 0x48d   : > { %s1607_s26 = scalar_lea.hbm %s1656_s5, %s1064_s17 }
 0x4cb   : > { %v419_v61 = vpop.xlane.xlu1 %418 }
 0x4cc   : > { %1240 = vrcp.f32 %v419_v61 }
 0x4cd   : > { %v422_v62 = vpop.xlane.xlu0 %421 }
 0x4ce   : > { %1242 = vrcp.f32 %v422_v62 }
 0x4cf   : > { %v549_v4 = vpop.permute.xlu1 %548 }
 0x4d6   : > { %v1241_v63 = vpop.eup %1240 }
 0x4d7   : > { %v425_v1 = vmul.f32 %v1241_v63, %v1225_v28  ;;  %v541_v5 = vpop.xlane.xlu0 %540 }
 0x4d8   : > { %v1243_v0 = vpop.eup %1242  ;;  %1244 = vrcp.f32 %v541_v5 }
 0x4d9   : > { %v426_v2 = vmul.f32 %v1243_v0, %v1227_v32 }
 0x4db   : > { %v427_v3 = vpack.c.bf16 %v426_v2, %v425_v1 }
 0x4dd   : > { %1095 = vmatmul.mubr.msk.bf16.vlgmr.msra.gmra.mrb[4].mxu0 %vm357_vm2, %v427_v3  ;;  %v664_v6 = vpop.xlane.xlu0 %663 }
 0x4de   : > { %1105 = vmatpush3.bf16.msra.mxu0 %v549_v4  ;;  %1106 = vmatprep.mubr.msk.bf16.mxu0 %vm1357_vm1, %v1356_v30 }
 0x4df   : > { %1116 = vmatprep.subr.bf16.mxu0 %v1356_v30 }
 0x4e2   : > { %v1245_v8 = vpop.eup %1244 }
 0x4e3   : > { %v545_v12 = vmul.f32 %v1245_v8, %v1229_v38 }
 0x4e5   : > { %v786_v9 = vpop.xlane.xlu0 %785 }
 0x4e9   : > { %v671_v16 = vpop.permute.xlu0 %670 }
 0x500   : > { %v538_v47 = vpop.xlane.xlu1 %537 }
 0x501   : > { %1246 = vrcp.f32 %v538_v47 }
 0x504   : > { %v661_v7 = vpop.xlane.xlu1 %660 }
 0x505   : > { %1248 = vrcp.f32 %v661_v7 }
 0x506   : > { %1250 = vrcp.f32 %v664_v6 }
 0x508   : > { %v783_v10 = vpop.xlane.xlu1 %782 }
 0x509   : > { %1252 = vrcp.f32 %v783_v10 }
 0x50a   : > { %1254 = vrcp.f32 %v786_v9 }
 0x50b   : > { %v1247_v11 = vpop.eup %1246 }
 0x50c   : > { %v544_v13 = vmul.f32 %v1247_v11, %v1235_v55  ;;  %v793_v22 = vpop.permute.xlu1 %792 }
 0x50e   : > { %v546_v14 = vpack.c.bf16 %v545_v12, %v544_v13 }
 0x50f   : > { %v1249_v15 = vpop.eup %1248 }
 0x510   : > { %1107 = vmatmul.mubr.msk.bf16.vlgmr.msra.gmra.mrb[8].mxu0 %vm357_vm2, %v546_v14  ;;  %v1251_v17 = vpop.eup %1250  ;;  %v667_v18 = vmul.f32 %v1249_v15, %v1237_v57 }
 0x511   : > { %1117 = vmatpush3.bf16.msra.mxu0 %v671_v16  ;;  %1118 = vmatprep.mubr.msk.bf16.mxu0 %vm1357_vm1, %v1356_v30  ;;  %v668_v19 = vmul.f32 %v1251_v17, %v1544_v42 }
 0x512   : > { %1128 = vmatprep.subr.bf16.mxu0 %v1356_v30 }
 0x513   : > { %v669_v20 = vpack.c.bf16 %v668_v19, %v667_v18  ;;  %v1253_v21 = vpop.eup %1252 }
 0x514   : > { %v1255_v23 = vpop.eup %1254  ;;  %v789_v24 = vmul.f32 %v1253_v21, %v1239_v59 }
 0x515   : > { %v790_v25 = vmul.f32 %v1255_v23, %v1550_v44 }
 0x517   : > { %v791_v26 = vpack.c.bf16 %v790_v25, %v789_v24 }
 0x518   : > { %1119 = vmatmul.mubr.msk.bf16.vlgmr.msra.gmra.mrb[12].mxu0 %vm357_vm2, %v669_v20 }
 0x519   : > { %1129 = vmatpush3.bf16.msra.mxu0 %v793_v22  ;;  %1130 = vmatprep.mubr.msk.bf16.mxu0 %vm1357_vm1, %v1356_v30 }
 0x520   : > { %1131 = vmatmul.mubr.msk.bf16.vlgmr.msra.gmra.mrb[16].mxu0 %vm357_vm2, %v791_v26 }
 0x5b0   : > { %v465_v27 = vpop.f32.mrb[4].mxu0 }
 0x5b1   : > { %v1096_v28 = vpop.f32.mrb[5].mxu0 }
 0x5b2   : > { %v468_v29 = vpop.f32.mrb[6].mxu0 }
 0x5b3   : > { %v472_v31 = vpack.c.bf16 %v468_v29, %v465_v27  ;;  %v1097_v32 = vpop.f32.mrb[7].mxu0 }
 0x5e3   : > { %v588_v35 = vpop.f32.mrb[8].mxu0 }
 0x5e4   : > { %v1108_v37 = vpop.f32.mrb[9].mxu0 }
 0x5e5   : > { %v591_v38 = vpop.f32.mrb[10].mxu0 }
 0x5e6   : > { %v595_v40 = vpack.c.bf16 %v591_v38, %v588_v35  ;;  %v1109_v41 = vpop.f32.mrb[11].mxu0 }
 0x5e8   : > { %841 = vrot.lane.b32.xlu1 %v595_v40, %s1364_s23 }
 0x5eb   : > { %v710_v42 = vpop.f32.mrb[12].mxu0 }
 0x5ec   : > { %v1120_v43 = vpop.f32.mrb[13].mxu0 }
 0x5ed   : > { %v713_v44 = vpop.f32.mrb[14].mxu0 }
 0x5ee   : > { %v717_v45 = vpack.c.bf16 %v713_v44, %v710_v42  ;;  %v1121_v46 = vpop.f32.mrb[15].mxu0 }
 0x5f0   : > { %844 = vrot.lane.b32.xlu1 %v717_v45, %s1362_s16  ;;  %s232_s16 = scalar_lea.vmem [#allocation5], %s1036_s13 }
 0x5f3   : > { %v832_v48 = vpop.f32.mrb[16].mxu0 }
 0x5f4   : > { %v1132_v49 = vpop.f32.mrb[17].mxu0 }
 0x5f5   : > { %v835_v50 = vpop.f32.mrb[18].mxu0 }
 0x5f6   : > { %v839_v51 = vpack.c.bf16 %v835_v50, %v832_v48  ;;  %v1133_v52 = vpop.f32.mrb[19].mxu0 }
 0x5f8   : > { %847 = vrot.lane.b32.xlu0 %v839_v51, %s1358_s12  ;;  %s956_s12 = sshll.u32 %s232_s16, 4  ;;  %s1601_s12 = int_to_ptr.vmem [resolvable:$true] %s956_s12 }
 0x5f9   : > { %s1284_s6 = scalar_lea.vmem %s1601_s12, 256  ;;  %p1291_p2 = scmp.lt.s32.totalorder %s1601_s12, %s1289_s10 }
 0x5fa   : > { %p1285_p6 = scmp.ne.s32.totalorder %s1601_s12, %s1284_s6  ;;  %p1292_p3 = scmp.lt.s32.totalorder %s1290_s8, %s1284_s6 }
 0x5fc   : > { %p1286_p10 = pnand %p1285_p6, %p1667_p9  ;;  %p1293_p4 = por %p1292_p3, %p1291_p2 }
 0x5fe   : > { %p1287_p12 = pneg %p1286_p10 }
 0x600   : > { %p1294_p7 = pnand %p1293_p4, %p1287_p12 }
 0x65a   : > { %v842_v30 = vpop.permute.xlu1 %841 }
 0x65b   : > { %v851_v54 = vsel %vm357_vm2, %v472_v31, %v842_v30 }
 0x662   : > { %v845_v53 = vpop.permute.xlu1 %844 }
 0x663   : > { %v853_v55 = vsel %vm241_vm0, %v851_v54, %v845_v53 }
 0x66a   : > { %v848_v56 = vpop.permute.xlu0 %847 }
 0x66b   : > { %v856_v57 = vsel %vm854_vm3, %v853_v55, %v848_v56 }
 0x66c   : > { %1143 = vmatmul.mubr.msk.bf16.vlgmr.msra.gmra.mrb[16].mxu1 %vm896_vm4, %v856_v57 }
 0x73f   : > { %v933_v59 = vpop.f32.mrb[16].mxu1 }
 0x740   : > { %v934_v60 = vadd.f32 %v1052_v58, %v933_v59  ;;  %v1144_v61 = vpop.f32.mrb[17].mxu1 }
 0x741   : > { %v936_v62 = vpop.f32.mrb[18].mxu1 }
 0x742   : > { %940 = vst.msk [vmem:[%s232_s16] sm:$0xff] %vm241_vm0, %v934_v60  ;;  %v937_v63 = vadd.f32 %v1052_v58, %v936_v62  ;;  %v1145_v0 = vpop.f32.mrb[19].mxu1 }
 0x744   : > { %941 = vst.msk [vmem:[%s232_s16 + $0x8] sm:$0xff] %vm241_vm0, %v937_v63 }
 0x745   : > { %1297 = shalt.err (!%p1294_p7)
}
 0x746   : > { %s1298_s11 = scalar_lea.hbm %s1607_s26, 256  ;;  %s1302_s13 = scalar_lea.hbm %s1656_s5, 512 }
 0x747   : > { %p1299_p8 = scmp.ne.s32.totalorder %s1607_s26, %s1298_s11  ;;  %p1303_p1 = scmp.lt.u32.totalorder %s1607_s26, %s1656_s5 }
 0x748   : > { %p1304_p0 = scmp.lt.u32.totalorder %s1302_s13, %s1298_s11  ;;  %p1306_p6 = scmp.lt.u32.totalorder %s1298_s11, %s1607_s26 }
 0x749   : > { %p1300_p11 = pnand %p1299_p8, %p1667_p9 }
 0x74a   : > { %p1305_p5 = por %p1304_p0, %p1303_p1 }
 0x74b   : > { %p1301_p13 = pneg %p1300_p11 }
 0x74c   : > { %p1307_p10 = por %p1306_p6, %p1305_p5 }
 0x74e   : > { %p1308_p12 = pnand %p1307_p10, %p1301_p13 }
 0x750   : > { %1311 = shalt.err (!%p1308_p12)
}
 0x751   : > { %s1366_s16 = smov 128   ;;  %s1367_s17 = smov 8  }
 0x752   : > { %1150 = dma.vmem_to_hbm [thread:$0]  (%p1667_p9), %s1601_s12, 256, %s1607_s26, %s1610_s22, %s1366_s16, %s1366_s16, %s1367_s17  }
 0x753 PF: > { %p1162_p2 = scmp.ge.s32.totalorder %s1350_s21, 2  ;;  %s971_s23 = sand.u32 1, %s1338_s18  }
 0x754   : > { %p1668_p3 = scmp.ne.s32.totalorder %s1661_s29, 0  ;;  %s972_s25 = scalar_lea.sflag [#allocation4], %s971_s23 }
 0x756   : > { %p1157_p4 = pnand %p1162_p2, %p1668_p3 }
 0x758   : > { %1333 = dma.done.wait (!%p1157_p4), %s972_s25, 256  }
 0x759   : > { %1335 = vsyncadd (!%p1157_p4), %s972_s25, 4294967040  ;;  %p16_p7 = scmp.ge.s32.totalorder %s1423_s24, 4   ;;  %s1669_s18 = smov %s1342_s19 }
 0x75a   : > { %s1670_s19 = smov %s1346_s20  ;;  %s1671_s20 = smov %s1434_s27 }
 0x75b   : > { %s1672_s21 = smov %s1423_s24  ;;  %18 = sbr.rel (!%p16_p7) target bundleno = 4 (0x4), region = 80 }
 0x762   :  { %977 = vsyncpa [#allocation3], 1 }
 0x763   :  { %979 = vsyncpa [#allocation3 + $0x1], 1 }
 0x764   :  { %980 = vsyncpa [#allocation4], 1 }
 0x765   :  { %982 = vsyncpa [#allocation4 + $0x1], 1 }

</bundles_post_ra>
